<compile_context>
chip_gen: v7x
topology: tpu7x:2x2x1
jax: 0.10.0
libtpu: 0.0.40
codegen_flags: <defaults>
</compile_context>

<pallas_src>
import functools

import jax
import jax.numpy as jnp
from jax import lax
from jax.experimental import pallas as pl
from jax.experimental.pallas import tpu as pltpu


# ----------------------------- Pallas kernels ------------------------------


def _deconv_stats_kernel(xu_ref, wk_ref, mask_ref, y_ref, stats_ref, *,
                         offsets, m_cols, cout):
    """Transposed conv (row-polyphase x width-dilated) + per-tile BN partial statistics.

    xu_ref   : (1, 1, Cin, Lt)       width-dilated input rows of this tile (+2 halo rows), bf16
    wk_ref   : (2K, 2*Cout, Cin)     fused per-offset weights; rows [0:Cout]  -> even output rows
                                     rows [Cout:] -> odd output rows, bf16
    mask_ref : (1, Mt)               1.0 on valid output columns (col % Wd < W_out), 0.0 on the
                                     K-1 junk columns per output row
    y_ref    : (1, 1, 2*Cout, Mt)    conv output for this tile, phase-major rows, bf16
    stats_ref: (1, 1, 2, Cout, 1)    [sum, sum_sq] per channel over valid columns (phases folded)
    """
    acc = None
    for idx, off in enumerate(offsets):                  # 2*K static offsets, unrolled
        rhs = xu_ref[0, 0, :, off:off + m_cols]           # (Cin, Mt) static lane-offset slice
        part = jnp.dot(wk_ref[idx], rhs, preferred_element_type=jnp.float32)
        acc = part if acc is None else acc + part         # (2*Cout, Mt) f32
    y_ref[...] = acc[None, None].astype(y_ref.dtype)

    masked = acc * mask_ref[...]                           # zero out junk columns
    s = jnp.sum(masked, axis=1, keepdims=True)             # (2*Cout, 1)
    q = jnp.sum(acc * masked, axis=1, keepdims=True)       # (2*Cout, 1)
    stats_ref[0, 0, 0] = s[:cout] + s[cout:]               # fold even/odd row phases -> (Cout,1)
    stats_ref[0, 0, 1] = q[:cout] + q[cout:]


def _bn_relu_interleave_kernel(y_ref, scale_ref, shift_ref, o_ref, *, cout, w_out):
    """Fused BN affine + ReLU + row-phase interleave; lane-dense full-block store.

    y_ref    : (1, 1, 2*Cout, TI, Wd)  bf16 conv output (rows [0:Cout]=even, [Cout:]=odd)
    scale_ref: (2*Cout, 1, 1)          gamma * rsqrt(var + eps), tiled over the two phases
    shift_ref: (2*Cout, 1, 1)          beta - mean * scale      (conv bias already cancelled)
    o_ref    : (1, Cout, TI, 2*W_out)  f32; column layout (ph*W_out + ow) is bit-identical to
                                       NCHW rows (2i+ph) after a metadata reshape outside.
    """
    y = y_ref[0, 0].astype(jnp.float32)                    # (2*Cout, TI, Wd)
    z = jnp.maximum(y * scale_ref[...] + shift_ref[...], 0.0)
    z_even = z[:cout, :, :w_out]                            # drop the K-1 junk columns
    z_odd = z[cout:, :, :w_out]
    o_ref[...] = jnp.concatenate([z_even, z_odd], axis=-1)[None]


# ------------------------------ wrapper (glue) ------------------------------


@functools.partial(jax.jit, static_argnames=("stride", "padding", "output_padding", "eps"))
def deconv_block_forward(x, w_t, b, gamma, beta, *,
                         stride=2, padding=1, output_padding=1, eps=1e-5):
    """DeConvBlock forward. x: [N, Cin, H, W] (NCHW) -> [N, Cout, 2H, 2W] (NCHW)."""
    del b  # conv bias only shifts the per-channel mean, which training-mode BN subtracts: it
           # cancels exactly and is folded out (see `shift` below).
    N, Cin, H, W = x.shape
    _, Cout, K, _ = w_t.shape
    assert stride == 2 and output_padding == 1 and K == 3 and padding == 1, \
        "kernel implements the module defaults (k=3, s=2, p=1, op=1)"

    H_out, W_out = 2 * H, 2 * W
    c0 = K - 1 - padding                  # first data column in the width-dilated row
    Wd = W_out + K - 1                    # dilated row length; K-1 junk cols per output row

    # --- row tiling: TI input rows -> 2*TI output rows per grid step -------------------------
    TI = 8 if (H % 8 == 0) else H
    n_t = H // TI
    assert n_t * TI == H
    Lt = (TI + 2) * Wd                    # per-tile flat length: +1 halo row, +1 safety row
    Mt = TI * Wd                          # per-tile flat output columns (incl. junk)
    offsets = tuple(range(K)) + tuple(Wd + d for d in range(K))
    assert max(offsets) + Mt <= Lt        # static in-bounds guarantee for the flat shifts

    # --- width-dilated, zero-padded input, bf16 (no row dilation; ~2.1x inflation only) ------
    xd = jnp.zeros((N, Cin, H + 2, Wd), jnp.bfloat16)
    xd = xd.at[:, :, :H, c0:c0 + 2 * W:2].set(x.astype(jnp.bfloat16))
    # per-tile row blocks with a 2-row halo (next tile's first row + safety row for junk reads)
    row_idx = (jnp.arange(n_t) * TI)[:, None] + jnp.arange(TI + 2)[None, :]
    xdt = jnp.moveaxis(xd[:, :, row_idx, :], 2, 1).reshape(N, n_t, Cin, Lt)

    # --- fused per-offset weights: each (2*Cout, Cin) matrix computes both row phases --------
    # even rows (ph=0): kh=1 @ row i ; odd rows (ph=1): kh=2 @ row i  and  kh=0 @ row i+1
    wf = jnp.flip(w_t, axis=3)                                   # flip along kw only
    wfk = jnp.transpose(wf, (2, 3, 1, 0))                        # (kh, d, Cout, Cin)
    low = jnp.concatenate([wfk[1], wfk[2]], axis=1)              # offsets d       (row i)
    high = jnp.concatenate([jnp.zeros_like(wfk[0]), wfk[0]], axis=1)  # offsets Wd+d (row i+1)
    wk = jnp.concatenate([low, high], axis=0).astype(jnp.bfloat16)    # (2K, 2*Cout, Cin)

    mask = ((jnp.arange(Mt, dtype=jnp.int32) % Wd) < W_out).astype(jnp.float32).reshape(1, Mt)

    # --- kernel A: transposed conv + per-tile BN partial stats (lane-dense, bf16) ------------
    kern_a = functools.partial(_deconv_stats_kernel, offsets=offsets, m_cols=Mt, cout=Cout)
    conv_y, stats = pl.pallas_call(
        kern_a,
        out_shape=(
            jax.ShapeDtypeStruct((N, n_t, 2 * Cout, Mt), jnp.bfloat16),
            jax.ShapeDtypeStruct((N, n_t, 2, Cout, 1), jnp.float32),
        ),
        grid=(N, n_t),
        in_specs=[
            pl.BlockSpec((1, 1, Cin, Lt), lambda n, t: (n, t, 0, 0)),
            pl.BlockSpec((2 * K, 2 * Cout, Cin), lambda n, t: (0, 0, 0)),
            pl.BlockSpec((1, Mt), lambda n, t: (0, 0)),
        ],
        out_specs=(
            pl.BlockSpec((1, 1, 2 * Cout, Mt), lambda n, t: (n, t, 0, 0)),
            pl.BlockSpec((1, 1, 2, Cout, 1), lambda n, t: (n, t, 0, 0, 0)),
        ),
        # per-tile partial sums -> no cross-step accumulator -> both axes "parallel"
        compiler_params=pltpu.CompilerParams(
            dimension_semantics=("parallel", "parallel")),
        # NOTE: per-step VMEM here is tens of KiB; for production decoder sizes re-derive TI
        # and set vmem_limit_bytes (v7x has 64 MiB physical VMEM).
    )(xdt, wk, mask)

    # --- fold BN (training-mode batch stats, biased variance) into scale/shift (tiny, XLA) ---
    count = jnp.float32(N * H_out * W_out)
    csum = jnp.sum(stats[:, :, 0, :, 0], axis=(0, 1))            # (Cout,)
    cssq = jnp.sum(stats[:, :, 1, :, 0], axis=(0, 1))
    mean = csum / count
    var = jnp.maximum(cssq / count - mean * mean, 0.0)           # biased var, PyTorch train BN
    inv_std = lax.rsqrt(var + eps)
    g32 = gamma.astype(jnp.float32)
    scale = g32 * inv_std
    shift = beta.astype(jnp.float32) - mean * scale              # conv bias cancelled here
    scale2 = jnp.concatenate([scale, scale]).reshape(2 * Cout, 1, 1)
    shift2 = jnp.concatenate([shift, shift]).reshape(2 * Cout, 1, 1)

    # --- kernel B: BN affine + ReLU + row-phase interleave, lane-dense full-block stores -----
    y5 = conv_y.reshape(N, n_t, 2 * Cout, TI, Wd)                # metadata-only reshape
    kern_b = functools.partial(_bn_relu_interleave_kernel, cout=Cout, w_out=W_out)
    out = pl.pallas_call(
        kern_b,
        out_shape=jax.ShapeDtypeStruct((N, Cout, H, 2 * W_out), jnp.float32),
        grid=(N, n_t),
        in_specs=[
            pl.BlockSpec((1, 1, 2 * Cout, TI, Wd), lambda n, t: (n, t, 0, 0, 0)),
            pl.BlockSpec((2 * Cout, 1, 1), lambda n, t: (0, 0, 0)),
            pl.BlockSpec((2 * Cout, 1, 1), lambda n, t: (0, 0, 0)),
        ],
        out_specs=pl.BlockSpec((1, Cout, TI, 2 * W_out), lambda n, t: (n, 0, t, 0)),
        compiler_params=pltpu.CompilerParams(
            dimension_semantics=("parallel", "parallel")),
    )(y5, scale2, shift2)

    # (co, i, ph*W_out+ow) contiguous == (co, 2i+ph, ow) contiguous -> metadata reshape to NCHW
    return out.reshape(N, Cout, H_out, W_out)


# ---------------------------------- main ------------------------------------


if __name__ == "__main__":
    # DeConvBlock(inplanes=4, planes=8, kernel_size=3, stride=2, padding=1)
    N, Cin, H, W = 2, 4, 16, 16
    Cout, K, stride, padding, output_padding = 8, 3, 2, 1, 1
    eps = 1e-5

    key = jax.random.PRNGKey(0)
    k1, k2, k3, k4, k5 = jax.random.split(key, 5)
    x = jax.random.normal(k1, (N, Cin, H, W), jnp.float32)
    w_t = 0.2 * jax.random.normal(k2, (Cin, Cout, K, K), jnp.float32)   # ConvTranspose2d weight
    b = 0.1 * jax.random.normal(k3, (Cout,), jnp.float32)
    gamma = 1.0 + 0.1 * jax.random.normal(k4, (Cout,), jnp.float32)
    beta = 0.1 * jax.random.normal(k5, (Cout,), jnp.float32)

    out = deconv_block_forward(x, w_t, b, gamma, beta,
                               stride=stride, padding=padding,
                               output_padding=output_padding, eps=eps)
    out = jax.block_until_ready(out)
    assert out.shape == (N, Cout, 2 * H, 2 * W), out.shape

    # Pure-JAX reference (ConvTranspose2d == lhs-dilated conv with flipped kernel).
    pad_lo = K - 1 - padding
    pad_hi = K - 1 - padding + output_padding
    w_oihw = jnp.transpose(jnp.flip(w_t, axis=(2, 3)), (1, 0, 2, 3))
    conv_ref = lax.conv_general_dilated(
        x, w_oihw, window_strides=(1, 1),
        padding=[(pad_lo, pad_hi), (pad_lo, pad_hi)],
        lhs_dilation=(stride, stride),
        dimension_numbers=("NCHW", "OIHW", "NCHW"),
    ) + b[None, :, None, None]
    mean = conv_ref.mean(axis=(0, 2, 3), keepdims=True)
    var = conv_ref.var(axis=(0, 2, 3), keepdims=True)    # biased, as PyTorch training BN
    ref = jnp.maximum(
        (conv_ref - mean) / jnp.sqrt(var + eps) * gamma[None, :, None, None]
        + beta[None, :, None, None], 0.0)

    if not bool(jnp.allclose(out, ref, rtol=3e-2, atol=3e-2)):
        raise AssertionError(
            f"mismatch vs reference, max abs diff = {float(jnp.max(jnp.abs(out - ref)))}")

    print("KERNEL_OK")
</pallas_src>

<mosaic_0001>
module attributes {stable_mosaic.version = 11 : i64} {
  func.func @_deconv_stats_kernel(%arg0: i32, %arg1: i32, %arg2: memref<1x1x4x340xbf16, #tpu.memory_space<vmem>>, %arg3: memref<6x16x4xbf16, #tpu.memory_space<vmem>>, %arg4: memref<1x272xf32, #tpu.memory_space<vmem>>, %arg5: memref<1x1x16x272xbf16, #tpu.memory_space<vmem>>, %arg6: memref<1x1x2x8x1xf32, #tpu.memory_space<vmem>>) attributes {dimension_semantics = [#tpu.dimension_semantics<parallel>, #tpu.dimension_semantics<parallel>], iteration_bounds = array<i64: 2, 2>, scalar_prefetch = 0 : i64, scratch_operands = 0 : i64, tpu.core_type = #tpu.core_type<tc>, window_params = [{transform_indices = @transform_0, window_bounds = array<i64: 1, 1, 4, 340>}, {pipeline_mode = #tpu.pipeline_mode<synchronous>, transform_indices = @transform_1, window_bounds = array<i64: 6, 16, 4>}, {pipeline_mode = #tpu.pipeline_mode<synchronous>, transform_indices = @transform_2, window_bounds = array<i64: 1, 272>}, {transform_indices = @transform_3, window_bounds = array<i64: 1, 1, 16, 272>}, {transform_indices = @transform_4, window_bounds = array<i64: 1, 1, 2, 8, 1>}]} {
    %c0 = arith.constant 0 : index
    %c0_0 = arith.constant 0 : index
    %c0_1 = arith.constant 0 : index
    %c0_2 = arith.constant 0 : index
    %0 = vector.load %arg2[%c0, %c0_0, %c0_1, %c0_2] : memref<1x1x4x340xbf16, #tpu.memory_space<vmem>>, vector<1x1x4x272xbf16>
    %1 = vector.shape_cast %0 : vector<1x1x4x272xbf16> to vector<4x272xbf16>
    %c0_3 = arith.constant 0 : index
    %c0_4 = arith.constant 0 : index
    %c0_5 = arith.constant 0 : index
    %2 = vector.load %arg3[%c0_3, %c0_4, %c0_5] : memref<6x16x4xbf16, #tpu.memory_space<vmem>>, vector<1x16x4xbf16>
    %3 = vector.shape_cast %2 : vector<1x16x4xbf16> to vector<16x4xbf16>
    %cst = arith.constant dense<0.000000e+00> : vector<16x272xf32>
    %4 = tpu.matmul %3, %1, %cst {dimension_numbers = #tpu.dot_dimension_numbers<[1], [0], [0], [1], [0, 0, 1, 1], [], []>} : vector<16x4xbf16>, vector<4x272xbf16>, vector<16x272xf32> -> vector<16x272xf32>
    %c0_6 = arith.constant 0 : index
    %c0_7 = arith.constant 0 : index
    %c0_8 = arith.constant 0 : index
    %c1 = arith.constant 1 : index
    %5 = vector.load %arg2[%c0_6, %c0_7, %c0_8, %c1] : memref<1x1x4x340xbf16, #tpu.memory_space<vmem>>, vector<1x1x4x272xbf16>
    %6 = vector.shape_cast %5 : vector<1x1x4x272xbf16> to vector<4x272xbf16>
    %c1_9 = arith.constant 1 : index
    %c0_10 = arith.constant 0 : index
    %c0_11 = arith.constant 0 : index
    %7 = vector.load %arg3[%c1_9, %c0_10, %c0_11] : memref<6x16x4xbf16, #tpu.memory_space<vmem>>, vector<1x16x4xbf16>
    %8 = vector.shape_cast %7 : vector<1x16x4xbf16> to vector<16x4xbf16>
    %cst_12 = arith.constant dense<0.000000e+00> : vector<16x272xf32>
    %9 = tpu.matmul %8, %6, %cst_12 {dimension_numbers = #tpu.dot_dimension_numbers<[1], [0], [0], [1], [0, 0, 1, 1], [], []>} : vector<16x4xbf16>, vector<4x272xbf16>, vector<16x272xf32> -> vector<16x272xf32>
    %10 = arith.addf %4, %9 : vector<16x272xf32>
    %c0_13 = arith.constant 0 : index
    %c0_14 = arith.constant 0 : index
    %c0_15 = arith.constant 0 : index
    %c2 = arith.constant 2 : index
    %11 = vector.load %arg2[%c0_13, %c0_14, %c0_15, %c2] : memref<1x1x4x340xbf16, #tpu.memory_space<vmem>>, vector<1x1x4x272xbf16>
    %12 = vector.shape_cast %11 : vector<1x1x4x272xbf16> to vector<4x272xbf16>
    %c2_16 = arith.constant 2 : index
    %c0_17 = arith.constant 0 : index
    %c0_18 = arith.constant 0 : index
    %13 = vector.load %arg3[%c2_16, %c0_17, %c0_18] : memref<6x16x4xbf16, #tpu.memory_space<vmem>>, vector<1x16x4xbf16>
    %14 = vector.shape_cast %13 : vector<1x16x4xbf16> to vector<16x4xbf16>
    %cst_19 = arith.constant dense<0.000000e+00> : vector<16x272xf32>
    %15 = tpu.matmul %14, %12, %cst_19 {dimension_numbers = #tpu.dot_dimension_numbers<[1], [0], [0], [1], [0, 0, 1, 1], [], []>} : vector<16x4xbf16>, vector<4x272xbf16>, vector<16x272xf32> -> vector<16x272xf32>
    %16 = arith.addf %10, %15 : vector<16x272xf32>
    %c0_20 = arith.constant 0 : index
    %c0_21 = arith.constant 0 : index
    %c0_22 = arith.constant 0 : index
    %c34 = arith.constant 34 : index
    %17 = vector.load %arg2[%c0_20, %c0_21, %c0_22, %c34] : memref<1x1x4x340xbf16, #tpu.memory_space<vmem>>, vector<1x1x4x272xbf16>
    %18 = vector.shape_cast %17 : vector<1x1x4x272xbf16> to vector<4x272xbf16>
    %c3 = arith.constant 3 : index
    %c0_23 = arith.constant 0 : index
    %c0_24 = arith.constant 0 : index
    %19 = vector.load %arg3[%c3, %c0_23, %c0_24] : memref<6x16x4xbf16, #tpu.memory_space<vmem>>, vector<1x16x4xbf16>
    %20 = vector.shape_cast %19 : vector<1x16x4xbf16> to vector<16x4xbf16>
    %cst_25 = arith.constant dense<0.000000e+00> : vector<16x272xf32>
    %21 = tpu.matmul %20, %18, %cst_25 {dimension_numbers = #tpu.dot_dimension_numbers<[1], [0], [0], [1], [0, 0, 1, 1], [], []>} : vector<16x4xbf16>, vector<4x272xbf16>, vector<16x272xf32> -> vector<16x272xf32>
    %22 = arith.addf %16, %21 : vector<16x272xf32>
    %c0_26 = arith.constant 0 : index
    %c0_27 = arith.constant 0 : index
    %c0_28 = arith.constant 0 : index
    %c35 = arith.constant 35 : index
    %23 = vector.load %arg2[%c0_26, %c0_27, %c0_28, %c35] : memref<1x1x4x340xbf16, #tpu.memory_space<vmem>>, vector<1x1x4x272xbf16>
    %24 = vector.shape_cast %23 : vector<1x1x4x272xbf16> to vector<4x272xbf16>
    %c4 = arith.constant 4 : index
    %c0_29 = arith.constant 0 : index
    %c0_30 = arith.constant 0 : index
    %25 = vector.load %arg3[%c4, %c0_29, %c0_30] : memref<6x16x4xbf16, #tpu.memory_space<vmem>>, vector<1x16x4xbf16>
    %26 = vector.shape_cast %25 : vector<1x16x4xbf16> to vector<16x4xbf16>
    %cst_31 = arith.constant dense<0.000000e+00> : vector<16x272xf32>
    %27 = tpu.matmul %26, %24, %cst_31 {dimension_numbers = #tpu.dot_dimension_numbers<[1], [0], [0], [1], [0, 0, 1, 1], [], []>} : vector<16x4xbf16>, vector<4x272xbf16>, vector<16x272xf32> -> vector<16x272xf32>
    %28 = arith.addf %22, %27 : vector<16x272xf32>
    %c0_32 = arith.constant 0 : index
    %c0_33 = arith.constant 0 : index
    %c0_34 = arith.constant 0 : index
    %c36 = arith.constant 36 : index
    %29 = vector.load %arg2[%c0_32, %c0_33, %c0_34, %c36] : memref<1x1x4x340xbf16, #tpu.memory_space<vmem>>, vector<1x1x4x272xbf16>
    %30 = vector.shape_cast %29 : vector<1x1x4x272xbf16> to vector<4x272xbf16>
    %c5 = arith.constant 5 : index
    %c0_35 = arith.constant 0 : index
    %c0_36 = arith.constant 0 : index
    %31 = vector.load %arg3[%c5, %c0_35, %c0_36] : memref<6x16x4xbf16, #tpu.memory_space<vmem>>, vector<1x16x4xbf16>
    %32 = vector.shape_cast %31 : vector<1x16x4xbf16> to vector<16x4xbf16>
    %cst_37 = arith.constant dense<0.000000e+00> : vector<16x272xf32>
    %33 = tpu.matmul %32, %30, %cst_37 {dimension_numbers = #tpu.dot_dimension_numbers<[1], [0], [0], [1], [0, 0, 1, 1], [], []>} : vector<16x4xbf16>, vector<4x272xbf16>, vector<16x272xf32> -> vector<16x272xf32>
    %34 = arith.addf %28, %33 : vector<16x272xf32>
    %35 = vector.shape_cast %34 : vector<16x272xf32> to vector<1x1x16x272xf32>
    %36 = arith.truncf %35 : vector<1x1x16x272xf32> to vector<1x1x16x272xbf16>
    %c0_38 = arith.constant 0 : index
    %c0_39 = arith.constant 0 : index
    %c0_40 = arith.constant 0 : index
    %c0_41 = arith.constant 0 : index
    %37 = vector.load %arg5[%c0_38, %c0_39, %c0_40, %c0_41] : memref<1x1x16x272xbf16, #tpu.memory_space<vmem>>, vector<1x1x16x272xbf16>
    tpu.vector_store %arg5[%c0_38, %c0_39, %c0_40, %c0_41], %36 {strides = array<i32>} : memref<1x1x16x272xbf16, #tpu.memory_space<vmem>>, vector<1x1x16x272xbf16>,
    %c0_42 = arith.constant 0 : index
    %c0_43 = arith.constant 0 : index
    %38 = vector.load %arg4[%c0_42, %c0_43] : memref<1x272xf32, #tpu.memory_space<vmem>>, vector<1x272xf32>
    %39 = vector.broadcast %38 : vector<1x272xf32> to vector<16x272xf32>
    %40 = arith.mulf %34, %39 : vector<16x272xf32>
    %cst_44 = arith.constant dense<0.000000e+00> : vector<16xf32>
    %41 = vector.multi_reduction <add>, %40, %cst_44 [1] : vector<16x272xf32> to vector<16xf32>
    %42 = vector.shape_cast %41 : vector<16xf32> to vector<16x1xf32>
    %43 = arith.mulf %34, %40 : vector<16x272xf32>
    %cst_45 = arith.constant dense<0.000000e+00> : vector<16xf32>
    %44 = vector.multi_reduction <add>, %43, %cst_45 [1] : vector<16x272xf32> to vector<16xf32>
    %45 = vector.shape_cast %44 : vector<16xf32> to vector<16x1xf32>
    %46 = vector.extract_strided_slice %42 {offsets = [0, 0], sizes = [8, 1], strides = [1, 1]} : vector<16x1xf32> to vector<8x1xf32>
    %47 = vector.extract_strided_slice %42 {offsets = [8, 0], sizes = [8, 1], strides = [1, 1]} : vector<16x1xf32> to vector<8x1xf32>
    %48 = arith.addf %46, %47 : vector<8x1xf32>
    %c0_46 = arith.constant 0 : index
    %c0_47 = arith.constant 0 : index
    %c0_48 = arith.constant 0 : index
    %c0_49 = arith.constant 0 : index
    %c0_50 = arith.constant 0 : index
    %49 = vector.load %arg6[%c0_46, %c0_47, %c0_48, %c0_49, %c0_50] : memref<1x1x2x8x1xf32, #tpu.memory_space<vmem>>, vector<1x1x1x8x1xf32>
    %50 = vector.shape_cast %49 : vector<1x1x1x8x1xf32> to vector<8x1xf32>
    %51 = vector.shape_cast %48 : vector<8x1xf32> to vector<1x1x1x8x1xf32>
    tpu.vector_store %arg6[%c0_46, %c0_47, %c0_48, %c0_49, %c0_50], %51 {strides = array<i32>} : memref<1x1x2x8x1xf32, #tpu.memory_space<vmem>>, vector<1x1x1x8x1xf32>,
    %52 = vector.extract_strided_slice %45 {offsets = [0, 0], sizes = [8, 1], strides = [1, 1]} : vector<16x1xf32> to vector<8x1xf32>
    %53 = vector.extract_strided_slice %45 {offsets = [8, 0], sizes = [8, 1], strides = [1, 1]} : vector<16x1xf32> to vector<8x1xf32>
    %54 = arith.addf %52, %53 : vector<8x1xf32>
    %c0_51 = arith.constant 0 : index
    %c0_52 = arith.constant 0 : index
    %c1_53 = arith.constant 1 : index
    %c0_54 = arith.constant 0 : index
    %c0_55 = arith.constant 0 : index
    %55 = vector.load %arg6[%c0_51, %c0_52, %c1_53, %c0_54, %c0_55] : memref<1x1x2x8x1xf32, #tpu.memory_space<vmem>>, vector<1x1x1x8x1xf32>
    %56 = vector.shape_cast %55 : vector<1x1x1x8x1xf32> to vector<8x1xf32>
    %57 = vector.shape_cast %54 : vector<8x1xf32> to vector<1x1x1x8x1xf32>
    tpu.vector_store %arg6[%c0_51, %c0_52, %c1_53, %c0_54, %c0_55], %57 {strides = array<i32>} : memref<1x1x2x8x1xf32, #tpu.memory_space<vmem>>, vector<1x1x1x8x1xf32>,
    return
  }
  func.func @transform_0(%arg0: i32, %arg1: i32) -> (i32, i32, i32, i32) {
    %c0_i32 = arith.constant 0 : i32
    %c0_i32_0 = arith.constant 0 : i32
    %c0_i32_1 = arith.constant 0 : i32
    return %arg0, %arg1, %c0_i32, %c0_i32_0 : i32, i32, i32, i32
  }
  func.func @transform_1(%arg0: i32, %arg1: i32) -> (i32, i32, i32) {
    %c0_i32 = arith.constant 0 : i32
    %c0_i32_0 = arith.constant 0 : i32
    %c0_i32_1 = arith.constant 0 : i32
    %c0_i32_2 = arith.constant 0 : i32
    return %c0_i32, %c0_i32_0, %c0_i32_1 : i32, i32, i32
  }
  func.func @transform_2(%arg0: i32, %arg1: i32) -> (i32, i32) {
    %c0_i32 = arith.constant 0 : i32
    %c0_i32_0 = arith.constant 0 : i32
    %c0_i32_1 = arith.constant 0 : i32
    return %c0_i32, %c0_i32_0 : i32, i32
  }
  func.func @transform_3(%arg0: i32, %arg1: i32) -> (i32, i32, i32, i32) {
    %c0_i32 = arith.constant 0 : i32
    %c0_i32_0 = arith.constant 0 : i32
    %c0_i32_1 = arith.constant 0 : i32
    return %arg0, %arg1, %c0_i32, %c0_i32_0 : i32, i32, i32, i32
  }
  func.func @transform_4(%arg0: i32, %arg1: i32) -> (i32, i32, i32, i32, i32) {
    %c0_i32 = arith.constant 0 : i32
    %c0_i32_0 = arith.constant 0 : i32
    %c0_i32_1 = arith.constant 0 : i32
    %c0_i32_2 = arith.constant 0 : i32
    return %arg0, %arg1, %c0_i32, %c0_i32_0, %c0_i32_1 : i32, i32, i32, i32, i32
  }
}

module attributes {stable_mosaic.version = 11 : i64} {
  func.func @_bn_relu_interleave_kernel(%arg0: i32, %arg1: i32, %arg2: memref<1x1x16x8x34xbf16, #tpu.memory_space<vmem>>, %arg3: memref<16x1x1xf32, #tpu.memory_space<vmem>>, %arg4: memref<16x1x1xf32, #tpu.memory_space<vmem>>, %arg5: memref<1x8x8x64xf32, #tpu.memory_space<vmem>>) attributes {dimension_semantics = [#tpu.dimension_semantics<parallel>, #tpu.dimension_semantics<parallel>], iteration_bounds = array<i64: 2, 2>, scalar_prefetch = 0 : i64, scratch_operands = 0 : i64, tpu.core_type = #tpu.core_type<tc>, window_params = [{transform_indices = @transform_0, window_bounds = array<i64: 1, 1, 16, 8, 34>}, {pipeline_mode = #tpu.pipeline_mode<synchronous>, transform_indices = @transform_1, window_bounds = array<i64: 16, 1, 1>}, {pipeline_mode = #tpu.pipeline_mode<synchronous>, transform_indices = @transform_2, window_bounds = array<i64: 16, 1, 1>}, {transform_indices = @transform_3, window_bounds = array<i64: 1, 8, 8, 64>}]} {
    %c0 = arith.constant 0 : index
    %c0_0 = arith.constant 0 : index
    %c0_1 = arith.constant 0 : index
    %c0_2 = arith.constant 0 : index
    %c0_3 = arith.constant 0 : index
    %0 = vector.load %arg2[%c0, %c0_0, %c0_1, %c0_2, %c0_3] : memref<1x1x16x8x34xbf16, #tpu.memory_space<vmem>>, vector<1x1x16x8x34xbf16>
    %1 = vector.shape_cast %0 : vector<1x1x16x8x34xbf16> to vector<16x8x34xbf16>
    %2 = arith.extf %1 : vector<16x8x34xbf16> to vector<16x8x34xf32>
    %c0_4 = arith.constant 0 : index
    %c0_5 = arith.constant 0 : index
    %c0_6 = arith.constant 0 : index
    %3 = vector.load %arg3[%c0_4, %c0_5, %c0_6] : memref<16x1x1xf32, #tpu.memory_space<vmem>>, vector<16x1x1xf32>
    %4 = vector.broadcast %3 : vector<16x1x1xf32> to vector<16x8x34xf32>
    %5 = arith.mulf %2, %4 : vector<16x8x34xf32>
    %c0_7 = arith.constant 0 : index
    %c0_8 = arith.constant 0 : index
    %c0_9 = arith.constant 0 : index
    %6 = vector.load %arg4[%c0_7, %c0_8, %c0_9] : memref<16x1x1xf32, #tpu.memory_space<vmem>>, vector<16x1x1xf32>
    %7 = vector.broadcast %6 : vector<16x1x1xf32> to vector<16x8x34xf32>
    %8 = arith.addf %5, %7 : vector<16x8x34xf32>
    %cst = arith.constant 0.000000e+00 : f32
    %9 = vector.broadcast %cst : f32 to vector<16x8x34xf32>
    %10 = arith.maximumf %8, %9 : vector<16x8x34xf32>
    %11 = vector.extract_strided_slice %10 {offsets = [0, 0, 0], sizes = [8, 8, 32], strides = [1, 1, 1]} : vector<16x8x34xf32> to vector<8x8x32xf32>
    %12 = vector.extract_strided_slice %10 {offsets = [8, 0, 0], sizes = [8, 8, 32], strides = [1, 1, 1]} : vector<16x8x34xf32> to vector<8x8x32xf32>
    %13 = tpu.concatenate %11, %12 in 2 : vector<8x8x32xf32>, vector<8x8x32xf32> -> vector<8x8x64xf32>
    %14 = vector.shape_cast %13 : vector<8x8x64xf32> to vector<1x8x8x64xf32>
    %c0_10 = arith.constant 0 : index
    %c0_11 = arith.constant 0 : index
    %c0_12 = arith.constant 0 : index
    %c0_13 = arith.constant 0 : index
    %15 = vector.load %arg5[%c0_10, %c0_11, %c0_12, %c0_13] : memref<1x8x8x64xf32, #tpu.memory_space<vmem>>, vector<1x8x8x64xf32>
    tpu.vector_store %arg5[%c0_10, %c0_11, %c0_12, %c0_13], %14 {strides = array<i32>} : memref<1x8x8x64xf32, #tpu.memory_space<vmem>>, vector<1x8x8x64xf32>,
    return
  }
  func.func @transform_0(%arg0: i32, %arg1: i32) -> (i32, i32, i32, i32, i32) {
    %c0_i32 = arith.constant 0 : i32
    %c0_i32_0 = arith.constant 0 : i32
    %c0_i32_1 = arith.constant 0 : i32
    %c0_i32_2 = arith.constant 0 : i32
    return %arg0, %arg1, %c0_i32, %c0_i32_0, %c0_i32_1 : i32, i32, i32, i32, i32
  }
  func.func @transform_1(%arg0: i32, %arg1: i32) -> (i32, i32, i32) {
    %c0_i32 = arith.constant 0 : i32
    %c0_i32_0 = arith.constant 0 : i32
    %c0_i32_1 = arith.constant 0 : i32
    %c0_i32_2 = arith.constant 0 : i32
    return %c0_i32, %c0_i32_0, %c0_i32_1 : i32, i32, i32
  }
  func.func @transform_2(%arg0: i32, %arg1: i32) -> (i32, i32, i32) {
    %c0_i32 = arith.constant 0 : i32
    %c0_i32_0 = arith.constant 0 : i32
    %c0_i32_1 = arith.constant 0 : i32
    %c0_i32_2 = arith.constant 0 : i32
    return %c0_i32, %c0_i32_0, %c0_i32_1 : i32, i32, i32
  }
  func.func @transform_3(%arg0: i32, %arg1: i32) -> (i32, i32, i32, i32) {
    %c0_i32 = arith.constant 0 : i32
    %c0_i32_0 = arith.constant 0 : i32
    %c0_i32_1 = arith.constant 0 : i32
    return %arg0, %c0_i32, %arg1, %c0_i32_0 : i32, i32, i32, i32
  }
}

</mosaic_0001>

<bundles_post_ra>
// kernel: deconv_block_forward.3
= control target key start
LH: loop header
LB: loop body
LE: loop exit
PB: predicated region body
PF: predicated region fallthrough
CT: control target
= control target key end

     0   :  { %s1010_s12 = smov 0   ;;  %s1012_s13 = smov 0   ;;  %s1257_s0 = inlined_call_operand.vmem [shape: bf16[2,2,16,8,34], index: 0, kind: input, shape index: {}]   ;;  %s1258_s1 = inlined_call_operand.vmem [shape: f32[16,1,1], index: 1, kind: input, shape index: {}]   ;;  %s1259_s2 = inlined_call_operand.vmem [shape: f32[16,1,1], index: 2, kind: input, shape index: {}]   ;;  %s1260_s3 = inlined_call_operand.vmem [shape: f32[2,8,16,64], index: 3, kind: output, shape index: {}]  }
   0x1   :  { %s1014_s14 = smov 0   ;;  %s1016_s15 = smov 0  }
   0x2   :  { %s1018_s16 = smov 0   ;;  %s1020_s17 = smov 0  }
   0x3   :  { %s1022_s18 = smov 0  }
   0x4 LB: > { %s22_s19 = sadd.s32 1, %s978_s16  ;;  %s25_s20 = sadd.s32 1, %s982_s17  ;;  %s986_s18 = sphi %s1022_s18, %s13_s18   ;;  %s982_s17 = sphi %s1020_s17, %s1267_s17   ;;  %s978_s16 = sphi %s1018_s16, %s1266_s16   ;;  %s974_s15 = sphi %s1016_s15, %s1265_s15   ;;  %s970_s14 = sphi %s1014_s14, %s1264_s14   ;;  %s966_s13 = sphi %s1012_s13, %s1263_s13   ;;  %s962_s12 = sphi %s1010_s12, %s1262_s12  }
   0x5   : > { %p23_p0 = scmp.ge.s32.totalorder %s22_s19, 2  ;;  %s787_s21 = sadd.s32 4294967295, %s986_s18  }
   0x6   : > { %p114_p1 = scmp.ne.s32.totalorder %s966_s13, %s962_s12  ;;  %p115_p2 = scmp.eq.s32.totalorder %s787_s21, 3 }
   0x7   : > { %s1269_s19 = smov (%p23_p0, %s22_s19), 0  ;;  %s1271_s20 = smov (!%p23_p0, %s25_s20), %s982_s17 }
   0x8   : > { %s100_s22 = ssub.s32 %s978_s16, %s1269_s19  ;;  %p27_p3 = scmp.ge.s32.totalorder %s1271_s20, 2 }
   0x9   : > { %p791_p4 = scmp.ge.s32.totalorder %s986_s18, 1  ;;  %p1056_p5 = por %p115_p2, %p114_p1 }
   0xa   : > { %p157_p6 = scmp.lt.s32.totalorder %s986_s18, 5  ;;  %s1273_s20 = smov (%p27_p3, %s1271_s20), 0 }
   0xb   : > { %s99_s24 = ssub.s32 %s982_s17, %s1273_s20  ;;  %s104_s26 = sadd.s32 1, %s966_s13 }
   0xc   : > { %p158_p7 = pnand %p791_p4, %p157_p6  ;;  %s101_s25 = sor.u32 %s100_s22, %s99_s24 }
   0xd   : > { %p102_p8 = scmp.eq.s32.totalorder %s101_s25, 0  ;;  %v798_v0 = vld [vmem:[%s1258_s1 + $0x2] ss:$0 sm:$0xff] (!%p158_p7)  ;;  %v796_v1 = vld [vmem:[%s1258_s1] ss:$0 sm:$0xff] (!%p158_p7)  ;;  %v988_v2 = vmov (!%p158_p7), 0  }
   0xe   : > { %161 = sbr.rel (%p158_p7) target bundleno = 309 (0x135), region = 32  ;;  %931 = vset.pattern.permute.xlu1 (!%p158_p7), %v988_v2  ;;  %930 = vset.pattern.permute.xlu0 (!%p158_p7), %v988_v2  ;;  %v799_v3 = vld [vmem:[%s1258_s1 + $0x3] ss:$0 sm:$0xff] (!%p158_p7)  ;;  %v797_v4 = vld [vmem:[%s1258_s1 + $0x1] ss:$0 sm:$0xff] (!%p158_p7)  ;;  %p184_p9 = scmp.lt.s32.totalorder (!%p158_p7), %s974_s15, 1 }
   0xf   : > { %s1067_s27 = scalar_select %p102_p8, %s966_s13, %s104_s26  }
  0x10   : > { %330 = vperm.xlu1 (!%p158_p7), %931, %v798_v0   ;;  %322 = vperm.xlu0 (!%p158_p7), %930, %v796_v1   ;;  %v805_v5 = vld [vmem:[%s1258_s1 + $0x9] ss:$0 sm:$0xff] (!%p158_p7)  ;;  %v804_v6 = vld [vmem:[%s1258_s1 + $0x8] ss:$0 sm:$0xff] (!%p158_p7)  ;;  %v807_v7 = vld [vmem:[%s1258_s1 + $0xb] ss:$0 sm:$0xff] (!%p158_p7) }
  0x11   : > { %v806_v8 = vld [vmem:[%s1258_s1 + $0xa] ss:$0 sm:$0xff] (!%p158_p7)  ;;  %v809_v9 = vld [vmem:[%s1258_s1 + $0xd] ss:$0 sm:$0xff] (!%p158_p7)  ;;  %v808_v10 = vld [vmem:[%s1258_s1 + $0xc] ss:$0 sm:$0xff] (!%p158_p7) }
  0x12   : > { %v811_v11 = vld [vmem:[%s1258_s1 + $0xf] ss:$0 sm:$0xff] (!%p158_p7)  ;;  %v810_v12 = vld [vmem:[%s1258_s1 + $0xe] ss:$0 sm:$0xff] (!%p158_p7)  ;;  %v821_v13 = vld [vmem:[%s1259_s2 + $0x9] ss:$0 sm:$0xff] (!%p158_p7) }
  0x13   : > { %v820_v14 = vld [vmem:[%s1259_s2 + $0x8] ss:$0 sm:$0xff] (!%p158_p7)  ;;  %v823_v15 = vld [vmem:[%s1259_s2 + $0xb] ss:$0 sm:$0xff] (!%p158_p7)  ;;  %v822_v16 = vld [vmem:[%s1259_s2 + $0xa] ss:$0 sm:$0xff] (!%p158_p7) }
  0x14   : > { %334 = vperm.xlu1 (!%p158_p7), %931, %v799_v3   ;;  %326 = vperm.xlu0 (!%p158_p7), %930, %v797_v4   ;;  %v825_v17 = vld [vmem:[%s1259_s2 + $0xd] ss:$0 sm:$0xff] (!%p158_p7)  ;;  %v824_v18 = vld [vmem:[%s1259_s2 + $0xc] ss:$0 sm:$0xff] (!%p158_p7)  ;;  %v827_v19 = vld [vmem:[%s1259_s2 + $0xf] ss:$0 sm:$0xff] (!%p158_p7) }
  0x15   : > { %v826_v20 = vld [vmem:[%s1259_s2 + $0xe] ss:$0 sm:$0xff]  ;;  %v801_v21 = vld [vmem:[%s1258_s1 + $0x5] ss:$0 sm:$0xff]  ;;  %v800_v22 = vld [vmem:[%s1258_s1 + $0x4] ss:$0 sm:$0xff] }
  0x16   : > { %v803_v23 = vld [vmem:[%s1258_s1 + $0x7] ss:$0 sm:$0xff]  ;;  %v802_v24 = vld [vmem:[%s1258_s1 + $0x6] ss:$0 sm:$0xff]  ;;  %v813_v25 = vld [vmem:[%s1259_s2 + $0x1] ss:$0 sm:$0xff] }
  0x17   : > { %v812_v26 = vld [vmem:[%s1259_s2] ss:$0 sm:$0xff]  ;;  %v815_v27 = vld [vmem:[%s1259_s2 + $0x3] ss:$0 sm:$0xff]  ;;  %v814_v28 = vld [vmem:[%s1259_s2 + $0x2] ss:$0 sm:$0xff] }
  0x18   : > { %358 = vperm.xlu1 %931, %v805_v5   ;;  %354 = vperm.xlu0 %930, %v804_v6   ;;  %v817_v29 = vld [vmem:[%s1259_s2 + $0x5] ss:$0 sm:$0xff]  ;;  %v816_v30 = vld [vmem:[%s1259_s2 + $0x4] ss:$0 sm:$0xff]  ;;  %v819_v31 = vld [vmem:[%s1259_s2 + $0x7] ss:$0 sm:$0xff] }
  0x19   : > { %v818_v32 = vld [vmem:[%s1259_s2 + $0x6] ss:$0 sm:$0xff]  ;;  %p186_p10 = scmp.lt.s32.totalorder %s970_s14, 1  ;;  %s989_s10 = smov 32   ;;  %vm625_vm0 = vcmask 261120   ;;  %vm634_vm1 = vcmask 523264  }
  0x1a   : > { %s185_s28 = scalar_select %p184_p9, %s974_s15, 1 }
  0x1b   : > { %s187_s29 = scalar_select %p186_p10, %s970_s14, 1 }
  0x1c   : > { %366 = vperm.xlu1 %931, %v807_v7   ;;  %362 = vperm.xlu0 %930, %v806_v8   ;;  %s794_s4 = sshll.u32 %s185_s28, 5  ;;  %s181_s11 = sand.u32 1, %s962_s12  }
  0x1d   : > { %s793_s30 = sshll.u32 %s187_s29, 4  ;;  %s792_s21 = sshll.u32 %s181_s11, 6 }
  0x1e   : > { %s190_s5 = sadd.s32 %s794_s4, %s793_s30  ;;  %s1197_s12 = scalar_lea.vmem [#allocation2], %s792_s21 }
  0x1f   : > { %s795_s6 = sshll.u32 %s190_s5, 2  ;;  %s829_s22 = sshll.u32 (%p1056_p5), %s974_s15, 4 }
  0x20   : > { %374 = vperm.xlu1 %931, %v809_v9   ;;  %370 = vperm.xlu0 %930, %v808_v10   ;;  %s1172_s9 = scalar_lea.vmem %s1257_s0, %s795_s6  ;;  %s651_s24 = sadd.s32 (%p1056_p5), %s970_s14, %s829_s22 }
  0x21   : > { %v865_v33 = vld [vmem:[%s1172_s9 + $0x8] sm:$0xff]   ;;  %v834_v34 = vld [vmem:[%s1172_s9] sm:$0xff]   ;;  %v870_v63 = vld [vmem:[%s1172_s9 + $0x30] sm:$0xff]   ;;  %s830_s23 = sshll.u32 (%p1056_p5), %s651_s24, 3 }
  0x22   : > { %v839_v35 = vunpack.c.l.bf16 %v865_v33  ;;  %v835_v36 = vunpack.c.l.bf16 %v834_v34  ;;  %v840_v41 = vunpack.c.h.bf16 %v865_v33  ;;  %v836_v42 = vunpack.c.h.bf16 %v834_v34  ;;  %v868_v51 = vld [vmem:[%s1172_s9 + $0x20] sm:$0xff]   ;;  %v869_v56 = vld [vmem:[%s1172_s9 + $0x28] sm:$0xff]   ;;  %v871_v8 = vld [vmem:[%s1172_s9 + $0x38] sm:$0xff]   ;;  %s653_s28 = scalar_lea.vmem (%p1056_p5), %s1260_s3, %s830_s23 }
  0x23   : > { %v852_v54 = vunpack.c.h.bf16 %v868_v51  ;;  %v851_v55 = vunpack.c.l.bf16 %v868_v51  ;;  %v856_v61 = vunpack.c.h.bf16 %v869_v56  ;;  %v855_v62 = vunpack.c.l.bf16 %v869_v56  ;;  %v867_v56 = vld [vmem:[%s1172_s9 + $0x18] sm:$0xff]  }
  0x24   : > { %382 = vperm.xlu1 %931, %v811_v11   ;;  %378 = vperm.xlu0 %930, %v810_v12   ;;  %v860_v4 = vunpack.c.h.bf16 %v870_v63  ;;  %v859_v5 = vunpack.c.l.bf16 %v870_v63 }
  0x28   : > { %534 = vperm.xlu1 %931, %v821_v13   ;;  %530 = vperm.xlu0 %930, %v820_v14  }
  0x2c   : > { %542 = vperm.xlu1 %931, %v823_v15   ;;  %538 = vperm.xlu0 %930, %v822_v16   ;;  %v864_v15 = vunpack.c.h.bf16 %v871_v8  ;;  %v863_v16 = vunpack.c.l.bf16 %v871_v8 }
  0x30   : > { %550 = vperm.xlu1 %931, %v825_v17   ;;  %546 = vperm.xlu0 %930, %v824_v18  }
  0x34   : > { %558 = vperm.xlu1 %931, %v827_v19   ;;  %554 = vperm.xlu0 %930, %v826_v20  }
  0x38   : > { %342 = vperm.xlu1 %931, %v801_v21   ;;  %338 = vperm.xlu0 %930, %v800_v22  }
  0x3c   : > { %350 = vperm.xlu1 %931, %v803_v23   ;;  %346 = vperm.xlu0 %930, %v802_v24  }
  0x40   : > { %502 = vperm.xlu1 %931, %v813_v25   ;;  %498 = vperm.xlu0 %930, %v812_v26  }
  0x44   : > { %510 = vperm.xlu1 %931, %v815_v27   ;;  %506 = vperm.xlu0 %930, %v814_v28  }
  0x48   : > { %518 = vperm.xlu1 %931, %v817_v29   ;;  %514 = vperm.xlu0 %930, %v816_v30  }
  0x4c   : > { %526 = vperm.xlu1 %931, %v819_v31   ;;  %522 = vperm.xlu0 %930, %v818_v32  }
  0x8f   : > { %v331_v37 = vpop.permute.xlu1 %330  ;;  %v323_v38 = vpop.permute.xlu0 %322 }
  0x90   : > { %v1176_v39 = vmul.f32 %v839_v35, %v331_v37  ;;  %v1178_v40 = vmul.f32 %v835_v36, %v323_v38 }
  0x93   : > { %v335_v43 = vpop.permute.xlu1 %334  ;;  %v327_v44 = vpop.permute.xlu0 %326 }
  0x94   : > { %v1180_v45 = vmul.f32 %v840_v41, %v335_v43  ;;  %v1182_v46 = vmul.f32 %v836_v42, %v327_v44 }
  0x97   : > { %v359_v47 = vpop.permute.xlu1 %358  ;;  %v355_v48 = vpop.permute.xlu0 %354 }
  0x98   : > { %v394_v59 = vmul.f32 %v852_v54, %v359_v47  ;;  %v393_v60 = vmul.f32 %v851_v55, %v355_v48 }
  0x9b   : > { %v367_v49 = vpop.permute.xlu1 %366  ;;  %v363_v50 = vpop.permute.xlu0 %362 }
  0x9c   : > { %v396_v6 = vmul.f32 %v856_v61, %v367_v49  ;;  %v395_v7 = vmul.f32 %v855_v62, %v363_v50  ;;  %v866_v49 = vld [vmem:[%s1172_s9 + $0x10] sm:$0xff]   ;;  %v848_v61 = vunpack.c.h.bf16 %v867_v56  ;;  %v847_v62 = vunpack.c.l.bf16 %v867_v56 }
  0x9d   : > { %v844_v54 = vunpack.c.h.bf16 %v866_v49  ;;  %v843_v55 = vunpack.c.l.bf16 %v866_v49 }
  0x9f   : > { %v375_v52 = vpop.permute.xlu1 %374  ;;  %v371_v53 = vpop.permute.xlu0 %370 }
  0xa0   : > { %v398_v17 = vmul.f32 %v860_v4, %v375_v52  ;;  %v397_v18 = vmul.f32 %v859_v5, %v371_v53 }
  0xa3   : > { %v383_v57 = vpop.permute.xlu1 %382  ;;  %v379_v58 = vpop.permute.xlu0 %378 }
  0xa4   : > { %v400_v25 = vmul.f32 %v864_v15, %v383_v57  ;;  %v399_v26 = vmul.f32 %v863_v16, %v379_v58 }
  0xa7   : > { %v535_v0 = vpop.permute.xlu1 %534  ;;  %v531_v1 = vpop.permute.xlu0 %530 }
  0xa8   : > { %v570_v2 = vadd.f32 %v535_v0, %v394_v59  ;;  %v569_v3 = vadd.f32 %v531_v1, %v393_v60 }
  0xaa   : > { %v586_v9 = vmax.f32 %v570_v2, 0.0  ;;  %v585_v10 = vmax.f32 %v569_v3, 0.0 }
  0xab   : > { %v543_v11 = vpop.permute.xlu1 %542  ;;  %v539_v12 = vpop.permute.xlu0 %538 }
  0xac   : > { %v572_v13 = vadd.f32 %v543_v11, %v396_v6  ;;  %v571_v14 = vadd.f32 %v539_v12, %v395_v7  ;;  %603 = vrot.lane.b32.xlu1 %v586_v9, %s989_s10  ;;  %601 = vrot.lane.b32.xlu0 %v585_v10, %s989_s10 }
  0xae   : > { %v588_v19 = vmax.f32 %v572_v13, 0.0  ;;  %v587_v20 = vmax.f32 %v571_v14, 0.0 }
  0xaf   : > { %v551_v21 = vpop.permute.xlu1 %550  ;;  %v547_v22 = vpop.permute.xlu0 %546 }
  0xb0   : > { %v574_v23 = vadd.f32 %v551_v21, %v398_v17  ;;  %v573_v24 = vadd.f32 %v547_v22, %v397_v18  ;;  %607 = vrot.lane.b32.xlu1 %v588_v19, %s989_s10  ;;  %605 = vrot.lane.b32.xlu0 %v587_v20, %s989_s10 }
  0xb2   : > { %v590_v27 = vmax.f32 %v574_v23, 0.0  ;;  %v589_v28 = vmax.f32 %v573_v24, 0.0 }
  0xb3   : > { %v559_v29 = vpop.permute.xlu1 %558  ;;  %v555_v30 = vpop.permute.xlu0 %554 }
  0xb4   : > { %v576_v31 = vadd.f32 %v559_v29, %v400_v25  ;;  %v575_v32 = vadd.f32 %v555_v30, %v399_v26  ;;  %611 = vrot.lane.b32.xlu1 %v590_v27, %s989_s10  ;;  %609 = vrot.lane.b32.xlu0 %v589_v28, %s989_s10 }
  0xb6   : > { %v592_v33 = vmax.f32 %v576_v31, 0.0  ;;  %v591_v34 = vmax.f32 %v575_v32, 0.0 }
  0xb7   : > { %v343_v35 = vpop.permute.xlu1 %342  ;;  %v339_v36 = vpop.permute.xlu0 %338 }
  0xb8   : > { %615 = vrot.lane.b32.xlu1 %v592_v33, %s989_s10  ;;  %613 = vrot.lane.b32.xlu0 %v591_v34, %s989_s10  ;;  %v390_v0 = vmul.f32 %v844_v54, %v343_v35 }
  0xbb   : > { %v351_v37 = vpop.permute.xlu1 %350  ;;  %v347_v38 = vpop.permute.xlu0 %346 }
  0xbc   : > { %v392_v7 = vmul.f32 %v848_v61, %v351_v37  ;;  %v391_v8 = vmul.f32 %v847_v62, %v347_v38 }
  0xbf   : > { %v503_v41 = vpop.permute.xlu1 %502  ;;  %v499_v42 = vpop.permute.xlu0 %498 }
  0xc0   : > { %v562_v50 = vadd.f32 %v503_v41, %v1182_v46  ;;  %v561_v51 = vadd.f32 %v499_v42, %v1178_v40  ;;  %v389_v40 = vmul.f32 %v843_v55, %v339_v36 }
  0xc2   : > { %v578_v57 = vmax.f32 %v562_v50, 0.0  ;;  %v577_v58 = vmax.f32 %v561_v51, 0.0 }
  0xc3   : > { %v511_v43 = vpop.permute.xlu1 %510  ;;  %v507_v44 = vpop.permute.xlu0 %506 }
  0xc4   : > { %v564_v59 = vadd.f32 %v511_v43, %v1180_v45  ;;  %v563_v60 = vadd.f32 %v507_v44, %v1176_v39 }
  0xc6   : > { %v580_v39 = vmax.f32 %v564_v59, 0.0  ;;  %v579_v45 = vmax.f32 %v563_v60, 0.0 }
  0xc7   : > { %v519_v47 = vpop.permute.xlu1 %518  ;;  %v515_v48 = vpop.permute.xlu0 %514 }
  0xc8   : > { %v566_v3 = vadd.f32 %v519_v47, %v390_v0  ;;  %v565_v4 = vadd.f32 %v515_v48, %v389_v40 }
  0xca   : > { %v582_v11 = vmax.f32 %v566_v3, 0.0  ;;  %v581_v12 = vmax.f32 %v565_v4, 0.0 }
  0xcb   : > { %v527_v52 = vpop.permute.xlu1 %526  ;;  %v523_v53 = vpop.permute.xlu0 %522 }
  0xcc   : > { %v568_v13 = vadd.f32 %v527_v52, %v392_v7  ;;  %v567_v14 = vadd.f32 %v523_v53, %v391_v8 }
  0xce   : > { %v584_v19 = vmax.f32 %v568_v13, 0.0  ;;  %v583_v20 = vmax.f32 %v567_v14, 0.0 }
 0x11e   : > { %v604_v63 = vpop.permute.xlu1 %603  ;;  %v602_v46 = vpop.permute.xlu0 %601 }
 0x11f   : > { %v627_v1 = vsel %vm625_vm0, %v578_v57, %v604_v63  ;;  %v626_v2 = vsel %vm625_vm0, %v577_v58, %v602_v46 }
 0x120   : > { %636 = vst.msk [vmem:[%s1197_s12 + $0x8] sm:$0xff] %vm634_vm1, %v627_v1  ;;  %635 = vst.msk [vmem:[%s1197_s12] sm:$0xff] %vm634_vm1, %v626_v2 }
 0x122   : > { %v608_v5 = vpop.permute.xlu1 %607  ;;  %v606_v6 = vpop.permute.xlu0 %605 }
 0x123   : > { %v629_v9 = vsel %vm625_vm0, %v580_v39, %v608_v5  ;;  %v628_v10 = vsel %vm625_vm0, %v579_v45, %v606_v6 }
 0x124   : > { %638 = vst.msk [vmem:[%s1197_s12 + $0x18] sm:$0xff] %vm634_vm1, %v629_v9  ;;  %637 = vst.msk [vmem:[%s1197_s12 + $0x10] sm:$0xff] %vm634_vm1, %v628_v10 }
 0x126   : > { %v612_v15 = vpop.permute.xlu1 %611  ;;  %v610_v16 = vpop.permute.xlu0 %609  ;;  %649 = sbr.rel (!%p1056_p5) target bundleno = 309 (0x135), region = 36 }
 0x127   : > { %v631_v17 = vsel %vm625_vm0, %v582_v11, %v612_v15  ;;  %v630_v18 = vsel %vm625_vm0, %v581_v12, %v610_v16  ;;  %v695_v25 = vld [vmem:[%s1197_s12] sm:$0xff] (%p1056_p5)  ;;  %v697_v26 = vld [vmem:[%s1197_s12 + $0x8] sm:$0xff] (%p1056_p5) }
 0x128   : > { %640 = vst.msk [vmem:[%s1197_s12 + $0x28] sm:$0xff] %vm634_vm1, %v631_v17  ;;  %639 = vst.msk [vmem:[%s1197_s12 + $0x20] sm:$0xff] %vm634_vm1, %v630_v18 }
 0x129   : > { %696 = vst [vmem:[%s653_s28] sm:$0xff] (%p1056_p5), %v695_v25  ;;  %698 = vst [vmem:[%s653_s28 + $0x10] sm:$0xff] (%p1056_p5), %v697_v26 }
 0x12a   : > { %v616_v21 = vpop.permute.xlu1 %615  ;;  %v614_v22 = vpop.permute.xlu0 %613 }
 0x12b   : > { %v633_v23 = vsel %vm625_vm0, %v584_v19, %v616_v21  ;;  %v632_v24 = vsel %vm625_vm0, %v583_v20, %v614_v22  ;;  %v699_v27 = vld [vmem:[%s1197_s12 + $0x10] sm:$0xff] (%p1056_p5)  ;;  %v701_v28 = vld [vmem:[%s1197_s12 + $0x18] sm:$0xff] (%p1056_p5) }
 0x12c   : > { %642 = vst.msk [vmem:[%s1197_s12 + $0x38] sm:$0xff] %vm634_vm1, %v633_v23  ;;  %641 = vst.msk [vmem:[%s1197_s12 + $0x30] sm:$0xff] %vm634_vm1, %v632_v24 }
 0x12d   : > { %700 = vst [vmem:[%s653_s28 + $0x20] sm:$0xff] %v699_v27  ;;  %702 = vst [vmem:[%s653_s28 + $0x30] sm:$0xff] %v701_v28 }
 0x12f   : > { %v703_v29 = vld [vmem:[%s1197_s12 + $0x20] sm:$0xff]  ;;  %v705_v30 = vld [vmem:[%s1197_s12 + $0x28] sm:$0xff] }
 0x130   : > { %704 = vst [vmem:[%s653_s28 + $0x40] sm:$0xff] %v703_v29  ;;  %706 = vst [vmem:[%s653_s28 + $0x50] sm:$0xff] %v705_v30 }
 0x133   : > { %v707_v31 = vld [vmem:[%s1197_s12 + $0x30] sm:$0xff]  ;;  %v709_v32 = vld [vmem:[%s1197_s12 + $0x38] sm:$0xff] }
 0x134   : > { %708 = vst [vmem:[%s653_s28 + $0x60] sm:$0xff] %v707_v31  ;;  %710 = vst [vmem:[%s653_s28 + $0x70] sm:$0xff] %v709_v32 }
 0x135 PF: > { %s13_s18 = sadd.s32 1, %s986_s18   ;;  %s1262_s12 = smov %s966_s13 }
 0x136   : > { %p10_p11 = scmp.ge.s32.totalorder %s13_s18, 6   ;;  %s1263_s13 = smov %s1067_s27 }
 0x137   : > { %s1264_s14 = smov %s978_s16  ;;  %s1265_s15 = smov %s982_s17 }
 0x138   : > { %s1266_s16 = smov %s1269_s19  ;;  %s1267_s17 = smov %s1273_s20 }
 0x139   :  { %12 = sbr.rel (!%p10_p11) target bundleno = 4 (0x4), region = 100 }

// kernel: deconv_block_forward.2
= control target key start
LH: loop header
LB: loop body
LE: loop exit
PB: predicated region body
PF: predicated region fallthrough
CT: control target
= control target key end

     0   :  { %s1552_s15 = smov 0   ;;  %s1554_s16 = smov 0   ;;  %s1720_s0 = inlined_call_operand.vmem [shape: bf16[2,2,4,340], index: 0, kind: input, shape index: {}]   ;;  %s1721_s1 = inlined_call_operand.vmem [shape: bf16[6,16,4], index: 1, kind: input, shape index: {}]   ;;  %s1722_s2 = inlined_call_operand.vmem [shape: f32[1,272], index: 2, kind: input, shape index: {}]   ;;  %s1723_s3 = inlined_call_operand.vmem [shape: bf16[2,2,16,272], index: 3, kind: output, shape index: {0}]   ;;  %s1724_s4 = inlined_call_operand.vmem [shape: f32[2,2,2,8,1], index: 4, kind: output, shape index: {1}]  }
   0x1   :  { %s1556_s17 = smov 0   ;;  %s1558_s18 = smov 0  }
   0x2   :  { %s1560_s19 = smov 0  }
   0x3 LB: > { %s24_s20 = sadd.s32 1, %s1508_s17  ;;  %s27_s21 = sadd.s32 1, %s1512_s18  ;;  %s1516_s19 = sphi %s1560_s19, %s15_s19   ;;  %s1512_s18 = sphi %s1558_s18, %s1728_s18   ;;  %s1508_s17 = sphi %s1556_s17, %s1727_s17   ;;  %s1504_s16 = sphi %s1554_s16, %s1726_s16   ;;  %s1500_s15 = sphi %s1552_s15, %s1725_s15  }
   0x4   : > { %p25_p0 = scmp.ge.s32.totalorder %s24_s20, 2  ;;  %p1275_p1 = scmp.ge.s32.totalorder %s1516_s19, 1 }
   0x5   : > { %p187_p2 = scmp.lt.s32.totalorder %s1516_s19, 5 }
   0x6   : > { %s1730_s20 = smov (%p25_p0, %s24_s20), 0  ;;  %s1732_s21 = smov (!%p25_p0, %s27_s21), %s1512_s18 }
   0x7   : > { %p188_p3 = pnand %p1275_p1, %p187_p2  ;;  %p29_p4 = scmp.ge.s32.totalorder %s1732_s21, 2 }
   0x8   : > { %p230_p5 = scmp.lt.s32.totalorder (!%p188_p3), %s1504_s16, 1  ;;  %p232_p6 = scmp.lt.s32.totalorder (!%p188_p3), %s1500_s15, 1  ;;  %v274_v0 = vlaneseq (!%p188_p3)  ;;  %v1518_v1 = vmov (!%p188_p3), 1983009808   ;;  %v1519_v3 = vmov (!%p188_p3), 0.0   ;;  %vm1520_vm0 = vmmov (!%p188_p3), 0  }
   0x9   : > { %s1734_s21 = smov (%p29_p4, %s1732_s21), 0  ;;  %191 = sbr.rel (%p188_p3) target bundleno = 580 (0x244), region = 32 }
   0xa   : > { %v272_v2 = vunpack.c.l.s4 (!%p188_p3), %v1518_v1  ;;  %1338 = vmatprep.subr.bf16.mxu1 (!%p188_p3), %v1519_v3  ;;  %v1587_v5 = vshrl.u32 (!%p188_p3), %v274_v0, 7  ;;  %1340 = vmatprep.mubr.msk.bf16.mxu1 (!%p188_p3), %vm1520_vm0, %v1519_v3  ;;  %v1521_v7 = vmov (!%p188_p3), 0   ;;  %s1522_s29 = smov (!%p188_p3), 127   ;;  %s1523_s30 = smov (!%p188_p3), 126   ;;  %vm299_vm1 = vcmask (!%p188_p3), 1041408   ;;  %v1472_v36 = vld [vmem:[%s1721_s1 + $0x8] sm:$0xff] (!%p188_p3)  }
   0xb   : > { %341 = vmatprep.mubr.bf16.mxu0 (!%p188_p3), %v1521_v7  ;;  %s1524_s5 = smov (!%p188_p3), 94   ;;  %s1525_s6 = smov (!%p188_p3), 93   ;;  %vm292_vm2 = vcmask (!%p188_p3), 1039360   ;;  %vm295_vm3 = vcmask (!%p188_p3), 31744   ;;  %vm526_vm4 = vcmask (!%p188_p3), 1031168   ;;  %v1473_v48 = vld [vmem:[%s1721_s1] sm:$0xff] (!%p188_p3)  }
   0xc   : > { %v273_v4 = vunpack.c.0.s8 (!%p188_p3), %v272_v2  ;;  %s1526_s7 = smov (!%p188_p3), 92   ;;  %vm663_vm5 = vcmask (!%p188_p3), 769024   ;;  %v1474_v56 = vld [vmem:[%s1721_s1 + $0x10] sm:$0xff] (!%p188_p3)   ;;  %vm800_vm6 = vcmask (!%p188_p3), 760832   ;;  %v1475_v0 = vld [vmem:[%s1721_s1 + $0x18] sm:$0xff] (!%p188_p3)   ;;  %vm937_vm7 = vcmask (!%p188_p3), 752640  }
   0xd   : > { %vm1063_vm8 = vcmask (!%p188_p3), 125952   ;;  %vm1091_vm9 = vcmask (!%p188_p3), 130048   ;;  %vm1118_vm10 = vcmask (!%p188_p3), 7168  }
   0xe   : > { %v276_v6 = vsub.s32 (!%p188_p3), %v273_v4, %v1587_v5 }
  0x10   : > { %s1736_s16 = smov (!%p230_p5, %s1504_s16), 1  ;;  %s1738_s15 = smov (!%p232_p6, %s1500_s15), 1 }
  0x11   : > { %s1415_s22 = smul.u32 6, %s1736_s16  ;;  %s1278_s10 = sshll.u32 %s1738_s15, 1 }
  0x12   : > { %s1414_s23 = smul.u32 3, %s1738_s15  ;;  %s1279_s11 = sshll.u32 %s1736_s16, 2 }
  0x13   : > { %s1416_s27 = smul.u32 6, %s1738_s15  ;;  %s254_s12 = sadd.s32 %s1279_s11, %s1278_s10 }
  0x14   : > { %s236_s24 = sadd.s32 %s1415_s22, %s1414_s23  ;;  %s1280_s13 = sshll.u32 %s254_s12, 3 }
  0x15   : > { %s1276_s25 = sshll.u32 %s236_s24, 1  ;;  %s256_s23 = scalar_lea.vmem %s1724_s4, %s1280_s13 }
  0x16   : > { %s1598_s28 = scalar_lea.vmem %s1720_s0, %s1276_s25 }
  0x17   : > { %v258_v8 = vld [vmem:[%s1598_s28] sm:$0x3f] }
  0x18   : > { %v1601_v9 = vrot.slane %v258_v8, %v276_v6  ;;  %v270_v10 = vcombine.high %v258_v8, %v258_v8  ;;  %v494_v11 = vld [vmem:[%s1598_s28] sm:$0x3f] }
  0x19   : > { %v511_v14 = vrot.slane %v494_v11, %v276_v6  ;;  %v504_v15 = vcombine.high %v494_v11, %v494_v11  ;;  %v631_v17 = vld [vmem:[%s1598_s28] sm:$0x3f] }
  0x1a   : > { %286 = vrot.lane.b32.xlu0 %v1601_v9, %s1522_s29  ;;  %v284_v12 = vrot.slane %v270_v10, %v276_v6  ;;  %v285_v13 = vcombine.high %v1601_v9, %v1601_v9  ;;  %v648_v19 = vrot.slane %v631_v17, %v276_v6  ;;  %v641_v20 = vcombine.high %v631_v17, %v631_v17  ;;  %v768_v22 = vld [vmem:[%s1598_s28] sm:$0x3f] }
  0x1b   : > { %v519_v16 = vcombine.high %v511_v14, %v511_v14  ;;  %v518_v18 = vrot.slane %v504_v15, %v276_v6  ;;  %v785_v24 = vrot.slane %v768_v22, %v276_v6  ;;  %v778_v25 = vcombine.high %v768_v22, %v768_v22  ;;  %v905_v27 = vld [vmem:[%s1598_s28] sm:$0x3f]  ;;  %s1417_s28 = smul.u32 12, %s1736_s16 }
  0x1c   : > { %290 = vrot.lane.b32.xlu1 %v284_v12, %s1522_s29  ;;  %v656_v21 = vcombine.high %v648_v19, %v648_v19  ;;  %v655_v23 = vrot.slane %v641_v20, %v276_v6  ;;  %v922_v29 = vrot.slane %v905_v27, %v276_v6  ;;  %v915_v30 = vcombine.high %v905_v27, %v905_v27  ;;  %v1476_v10 = vld [vmem:[%s1721_s1 + $0x20] sm:$0xff]  }
  0x1d   : > { %v793_v26 = vcombine.high %v785_v24, %v785_v24  ;;  %v792_v28 = vrot.slane %v778_v25, %v276_v6  ;;  %v408_v40 = vsel %vm299_vm1, %v284_v12, 0  ;;  %v402_v43 = vsel %vm299_vm1, %v1601_v9, 0 }
  0x1e   : > { %288 = vrot.lane.b32.xlu0 %v285_v13, %s1522_s29  ;;  %v930_v31 = vcombine.high %v922_v29, %v922_v29  ;;  %v929_v32 = vrot.slane %v915_v30, %v276_v6  ;;  %v1079_v15 = vsub.s32 2, %v1587_v5  ;;  %s245_s29 = sadd.s32 %s1417_s28, %s1416_s27 }
  0x20   : > { %520 = vrot.lane.b32.xlu1 %v511_v14, %s1523_s30  ;;  %v1477_v14 = vld [vmem:[%s1721_s1 + $0x28] sm:$0xff]  }
  0x22   : > { %522 = vrot.lane.b32.xlu0 %v519_v16, %s1523_s30  ;;  %v1071_v16 = vsub.s32 0, %v1587_v5 }
  0x24   : > { %524 = vrot.lane.b32.xlu1 %v518_v18, %s1523_s30 }
  0x26   : > { %657 = vrot.lane.b32.xlu0 %v648_v19, %s1524_s5 }
  0x28   : > { %659 = vrot.lane.b32.xlu1 %v656_v21, %s1524_s5 }
  0x2a   : > { %661 = vrot.lane.b32.xlu0 %v655_v23, %s1524_s5 }
  0x2c   : > { %794 = vrot.lane.b32.xlu1 %v785_v24, %s1525_s6 }
  0x2e   : > { %796 = vrot.lane.b32.xlu0 %v793_v26, %s1525_s6 }
  0x30   : > { %798 = vrot.lane.b32.xlu1 %v792_v28, %s1525_s6  ;;  %s1277_s6 = sshll.u32 %s245_s29, 2 }
  0x31   : > { %s1690_s9 = scalar_lea.vmem %s1723_s3, %s1277_s6 }
  0x32   : > { %931 = vrot.lane.b32.xlu0 %v922_v29, %s1526_s7 }
  0x34   : > { %933 = vrot.lane.b32.xlu1 %v930_v31, %s1526_s7 }
  0x36   : > { %935 = vrot.lane.b32.xlu0 %v929_v32, %s1526_s7 }
  0x8c   : > { %v287_v33 = vpop.permute.xlu0 %286 }
  0x8e   : > { %v291_v34 = vpop.permute.xlu1 %290 }
  0x8f   : > { %v307_v35 = vsel %vm299_vm1, %v291_v34, 0 }
  0x90   : > { %v289_v37 = vpop.permute.xlu0 %288  ;;  %1339 = vmatpush3.bf16.msra.mxu1 %v307_v35 }
  0x91   : > { %v294_v38 = vsel %vm292_vm2, %v289_v37, %v291_v34  ;;  %v293_v39 = vsel %vm292_vm2, %v287_v33, %v289_v37  ;;  %1344 = vmatprep.subr.bf16.mxu1 %v1519_v3 }
  0x92   : > { %1284 = vmatprep.subr.msk.bf16.mxu0 %vm299_vm1, %v294_v38  ;;  %v301_v41 = vsel %vm299_vm1, %v293_v39, 0  ;;  %v521_v42 = vpop.permute.xlu1 %520 }
  0x93   : > { %310 = vmatpush1.bf16.msra.mxu0 %v301_v41  ;;  %1341 = vmatmul.mubr.msk.bf16.vlgmr.msra.gmra.mrb[0].mxu1 %vm295_vm3, %v1472_v36 }
  0x94   : > { %1288 = vmatprep.subr.msk.bf16.mxu0 %vm299_vm1, %v285_v13  ;;  %1345 = vmatpush3.bf16.msra.mxu1 %v408_v40  ;;  %v523_v44 = vpop.permute.xlu0 %522 }
  0x95   : > { %1346 = vmatprep.mubr.msk.bf16.mxu1 %vm1520_vm0, %v1519_v3  ;;  %1350 = vmatprep.subr.bf16.mxu1 %v1519_v3  ;;  %v527_v49 = vsel %vm526_vm4, %v521_v42, %v523_v44 }
  0x96   : > { %1285 = vmatmul.mubr.msk.bf16.vlgmr.msra.gmra.mrb[0].mxu0 %vm295_vm3, %v1472_v36  ;;  %v525_v45 = vpop.permute.xlu1 %524  ;;  %v533_v53 = vsel %vm299_vm1, %v527_v49, 0 }
  0x97   : > { %411 = vmatpush1.bf16.msra.mxu0 %v402_v43  ;;  %v528_v46 = vsel %vm526_vm4, %v523_v44, %v525_v45  ;;  %442 = vmatprep.mubr.bf16.mxu0 %v1521_v7  ;;  %v539_v50 = vsel %vm299_vm1, %v525_v45, 0 }
  0x98   : > { %1294 = vmatprep.subr.msk.bf16.mxu0 %vm299_vm1, %v528_v46  ;;  %v658_v47 = vpop.permute.xlu0 %657 }
  0x9a   : > { %v660_v51 = vpop.permute.xlu1 %659 }
  0x9b   : > { %v664_v57 = vsel %vm663_vm5, %v658_v47, %v660_v51 }
  0x9c   : > { %v662_v52 = vpop.permute.xlu0 %661  ;;  %v670_v61 = vsel %vm299_vm1, %v664_v57, 0 }
  0x9d   : > { %v665_v54 = vsel %vm663_vm5, %v660_v51, %v662_v52  ;;  %v676_v58 = vsel %vm299_vm1, %v662_v52, 0 }
  0x9e   : > { %v795_v55 = vpop.permute.xlu1 %794 }
  0x9f   : > { %1347 = vmatmul.mubr.msk.bf16.vlgmr.msra.gmra.mrb[0].mxu1 %vm295_vm3, %v1473_v48 }
  0xa0   : > { %1351 = vmatpush3.bf16.msra.mxu1 %v539_v50  ;;  %1352 = vmatprep.mubr.msk.bf16.mxu1 %vm1520_vm0, %v1519_v3  ;;  %v797_v59 = vpop.permute.xlu0 %796 }
  0xa1   : > { %1356 = vmatprep.subr.bf16.mxu1 %v1519_v3  ;;  %v801_v1 = vsel %vm800_vm6, %v795_v55, %v797_v59 }
  0xa2   : > { %1289 = vmatmul.mubr.msk.bf16.vlgmr.msra.gmra.mrb[0].mxu0 %vm295_vm3, %v1473_v48  ;;  %v799_v60 = vpop.permute.xlu1 %798  ;;  %v807_v8 = vsel %vm299_vm1, %v801_v1, 0 }
  0xa3   : > { %542 = vmatpush1.bf16.msra.mxu0 %v533_v53  ;;  %573 = vmatprep.mubr.bf16.mxu0 %v1521_v7  ;;  %v802_v62 = vsel %vm800_vm6, %v797_v59, %v799_v60  ;;  %v813_v2 = vsel %vm299_vm1, %v799_v60, 0 }
  0xa4   : > { %1300 = vmatprep.subr.msk.bf16.mxu0 %vm299_vm1, %v665_v54  ;;  %v932_v63 = vpop.permute.xlu0 %931 }
  0xa6   : > { %v934_v4 = vpop.permute.xlu1 %933 }
  0xa7   : > { %v938_v11 = vsel %vm937_vm7, %v932_v63, %v934_v4 }
  0xa8   : > { %v936_v6 = vpop.permute.xlu0 %935  ;;  %v944_v13 = vsel %vm299_vm1, %v938_v11, 0 }
  0xa9   : > { %v939_v9 = vsel %vm937_vm7, %v934_v4, %v936_v6  ;;  %v950_v12 = vsel %vm299_vm1, %v936_v6, 0 }
  0xab   : > { %1353 = vmatmul.mubr.msk.bf16.vlgmr.msra.gmra.mrb[0].mxu1 %vm295_vm3, %v1474_v56 }
  0xac   : > { %1357 = vmatpush3.bf16.msra.mxu1 %v676_v58  ;;  %1358 = vmatprep.mubr.msk.bf16.mxu1 %vm1520_vm0, %v1519_v3 }
  0xad   : > { %1362 = vmatprep.subr.bf16.mxu1 %v1519_v3 }
  0xae   : > { %1295 = vmatmul.mubr.msk.bf16.vlgmr.msra.gmra.mrb[0].mxu0 %vm295_vm3, %v1474_v56 }
  0xaf   : > { %679 = vmatpush1.bf16.msra.mxu0 %v670_v61  ;;  %710 = vmatprep.mubr.bf16.mxu0 %v1521_v7 }
  0xb0   : > { %1306 = vmatprep.subr.msk.bf16.mxu0 %vm299_vm1, %v802_v62 }
  0xb7   : > { %1359 = vmatmul.mubr.msk.bf16.vlgmr.msra.gmra.mrb[0].mxu1 %vm295_vm3, %v1475_v0 }
  0xb8   : > { %1363 = vmatpush3.bf16.msra.mxu1 %v813_v2  ;;  %1364 = vmatprep.mubr.msk.bf16.mxu1 %vm1520_vm0, %v1519_v3 }
  0xb9   : > { %1368 = vmatprep.subr.bf16.mxu1 %v1519_v3 }
  0xba   : > { %1301 = vmatmul.mubr.msk.bf16.vlgmr.msra.gmra.mrb[0].mxu0 %vm295_vm3, %v1475_v0 }
  0xbb   : > { %816 = vmatpush1.bf16.msra.mxu0 %v807_v8  ;;  %847 = vmatprep.mubr.bf16.mxu0 %v1521_v7 }
  0xbc   : > { %1312 = vmatprep.subr.msk.bf16.mxu0 %vm299_vm1, %v939_v9 }
  0xc3   : > { %1365 = vmatmul.mubr.msk.bf16.vlgmr.msra.gmra.mrb[0].mxu1 %vm295_vm3, %v1476_v10 }
  0xc4   : > { %1369 = vmatpush3.bf16.msra.mxu1 %v950_v12  ;;  %1370 = vmatprep.mubr.msk.bf16.mxu1 %vm1520_vm0, %v1519_v3  ;;  %v1067_v3 = vld [vmem:[%s1722_s2] sm:$0x7] }
  0xc5   : > { %v1080_v17 = vrot.slane %v1067_v3, %v1079_v15  ;;  %v1072_v19 = vrot.slane %v1067_v3, %v1071_v16 }
  0xc6   : > { %1307 = vmatmul.mubr.msk.bf16.vlgmr.msra.gmra.mrb[0].mxu0 %vm295_vm3, %v1476_v10 }
  0xc7   : > { %953 = vmatpush1.bf16.msra.mxu0 %v944_v13  ;;  %984 = vmatprep.mubr.bf16.mxu0 %v1521_v7  ;;  %v1075_v7 = vsub.s32 1, %v1587_v5 }
  0xc9   : > { %v1076_v22 = vrot.slane %v1067_v3, %v1075_v7 }
  0xcf   : > { %1371 = vmatmul.mubr.msk.bf16.vlgmr.msra.gmra.mrb[0].mxu1 %vm295_vm3, %v1477_v14 }
  0xd2   : > { %1313 = vmatmul.mubr.msk.bf16.vlgmr.msra.gmra.mrb[0].mxu0 %vm295_vm3, %v1477_v14 }
 0x1a2   : > { %v1029_v18 = vpop.f32.mrb[0].mxu1 }
 0x1a3   : > { %v1323_v20 = vpack.c.bf16 %v1029_v18, %v1029_v18  ;;  %v1372_v21 = vpop.f32.mrb[1].mxu1  ;;  %v1086_v23 = vmul.f32 %v1080_v17, %v1029_v18 }
 0x1a4   : > { %v1032_v24 = vpop.f32.mrb[2].mxu1 }
 0x1a5   : > { %v1325_v25 = vpack.c.bf16 %v1032_v24, %v1032_v24  ;;  %v986_v26 = vpop.f32.mrb[0].mxu0  ;;  %v1373_v5 = vpop.f32.mrb[3].mxu1  ;;  %1064 = vst.msk [vmem:[%s1690_s9 + $0x8] sm:$0xf] %vm1063_vm8, %v1323_v20  ;;  %v1089_v27 = vmul.f32 %v1080_v17, %v1032_v24  ;;  %v1103_v33 = vmul.f32 %v1086_v23, %v1029_v18  ;;  %v1092_v43 = vsel %vm1091_vm9, %v1086_v23, 0.0 }
 0x1a6   : > { %v1084_v28 = vmul.f32 %v1072_v19, %v986_v26  ;;  %v988_v29 = vpop.f32.mrb[1].mxu0 }
 0x1a7   : > { %v1322_v30 = vpack.c.bf16 %v988_v29, %v986_v26  ;;  %1066 = vst.msk [vmem:[%s1690_s9 + $0x14] sm:$0xf] %vm1063_vm8, %v1325_v25  ;;  %v1085_v31 = vmul.f32 %v1076_v22, %v988_v29  ;;  %v990_v32 = vpop.f32.mrb[2].mxu0  ;;  %v1106_v41 = vmul.f32 %v1089_v27, %v1032_v24  ;;  %v1097_v48 = vsel %vm1091_vm9, %v1089_v27, 0.0 }
 0x1a8   : > { %v1101_v34 = vmul.f32 %v1084_v28, %v986_v26  ;;  %v1087_v35 = vmul.f32 %v1072_v19, %v990_v32  ;;  %v992_v36 = vpop.f32.mrb[3].mxu0  ;;  %v1108_v49 = vsel %vm1091_vm9, %v1103_v33, 0.0 }
 0x1a9   : > { %1062 = vst [vmem:[%s1690_s9] sm:$0xff] %v1322_v30  ;;  %v1102_v37 = vmul.f32 %v1085_v31, %v988_v29  ;;  %v1324_v38 = vpack.c.bf16 %v992_v36, %v990_v32  ;;  %v1088_v39 = vmul.f32 %v1076_v22, %v992_v36  ;;  %v1090_v40 = vadd.f32 %v1085_v31, %v1084_v28 }
 0x1aa   : > { %v1104_v42 = vmul.f32 %v1087_v35, %v990_v32  ;;  %v1113_v53 = vsel %vm1091_vm9, %v1106_v41, 0.0 }
 0x1ab   : > { %1065 = vst [vmem:[%s1690_s9 + $0xc] sm:$0xff] %v1324_v38  ;;  %v1105_v44 = vmul.f32 %v1088_v39, %v992_v36  ;;  %v1093_v45 = vadd.f32 %v1092_v43, %v1090_v40  ;;  %v1096_v46 = vadd.f32 %v1088_v39, %v1087_v35  ;;  %v1107_v47 = vadd.f32 %v1102_v37, %v1101_v34 }
 0x1ad   : > { %1094 = vadd.xlane.f32.xlu1 %v1093_v45  ;;  %v1098_v50 = vadd.f32 %v1097_v48, %v1096_v46  ;;  %v1112_v51 = vadd.f32 %v1105_v44, %v1104_v42  ;;  %v1109_v52 = vadd.f32 %v1108_v49, %v1107_v47 }
 0x1af   : > { %1099 = vadd.xlane.f32.xlu0 %v1098_v50  ;;  %v1114_v54 = vadd.f32 %v1113_v53, %v1112_v51 }
 0x1b1   : > { %1115 = vadd.xlane.f32.xlu1 %v1114_v54 }
 0x1b3   : > { %1110 = vadd.xlane.f32.xlu0 %v1109_v52 }
 0x23a   : > { %v1095_v55 = vpop.xlane.xlu1 %1094 }
 0x23c   : > { %v1100_v56 = vpop.xlane.xlu0 %1099 }
 0x23d   : > { %v1117_v57 = vadd.f32 %v1100_v56, %v1095_v55 }
 0x23e   : > { %v1116_v58 = vpop.xlane.xlu1 %1115 }
 0x23f   : > { %1119 = vst.msk [vmem:[%s256_s23] sm:$0xff] %vm1118_vm10, %v1117_v57 }
 0x240   : > { %v1111_v59 = vpop.xlane.xlu0 %1110 }
 0x241   : > { %v1120_v60 = vadd.f32 %v1116_v58, %v1111_v59 }
 0x243   : > { %1319 = vst.msk [vmem:[%s256_s23 + $0x8] sm:$0xff] %vm1118_vm10, %v1120_v60 }
 0x244 PF: > { %s15_s19 = sadd.s32 1, %s1516_s19   ;;  %s1725_s15 = smov %s1508_s17 }
 0x245   : > { %p12_p7 = scmp.ge.s32.totalorder %s15_s19, 6   ;;  %s1726_s16 = smov %s1512_s18 }
 0x246   : > { %s1727_s17 = smov %s1730_s20  ;;  %s1728_s18 = smov %s1734_s21 }
 0x247   :  { %14 = sbr.rel (!%p12_p7) target bundleno = 3 (0x3), region = 80 }

</bundles_post_ra>
